<compile_context>
chip_gen: v5e
topology: v5e:2x2
jax: 0.10.0
libtpu: 0.0.40
codegen_flags: <defaults>
</compile_context>

<pallas_src>
import jax
import jax.numpy as jnp
from jax.experimental import pallas as pl
from jax.experimental.pallas import tpu as pltpu


_DMA_WINDOW = 8  # max in-flight row DMAs in the HBM-gather fallback path


def _vmem_capacity_bytes():
    """Per-core VMEM capacity; conservative fallback (v7x = 64 MiB) if unavailable."""
    try:
        info = pltpu.get_tpu_info()
        cap = getattr(info, "vmem_capacity_bytes", None)
        if cap:
            return int(cap)
    except Exception:
        pass
    return 64 << 20


# ----------------------------------------------------------------------------------
# Path A: table fits VMEM.  One contiguous table DMA (block index constant across the
# grid -> fetched once), on-chip row gather into a persistent VMEM scratch at b == 0,
# then one full-block (S, D) store per batch row (fused broadcast).
# ----------------------------------------------------------------------------------
def _vmem_gather_kernel(pos_ref, emb_ref, out_ref, gathered):
    # pos_ref:  (S,)  int32 in SMEM (scalar prefetch)
    # emb_ref:  (P,D) embedding table, VMEM resident
    # out_ref:  (S,D) view of this batch row's (1,S,D) output block
    # gathered: (S,D) VMEM scratch, persists across grid steps
    S = gathered.shape[0]

    @pl.when(pl.program_id(0) == 0)
    def _gather_once():
        if S <= 32:
            # tiny S: static unroll (review: keep unroll for small S)
            for i in range(S):
                gathered[pl.ds(i, 1), :] = emb_ref[pl.ds(pos_ref[i], 1), :]
        else:
            # large S: keep program size bounded
            @pl.loop(0, S)
            def _(i):
                gathered[pl.ds(i, 1), :] = emb_ref[pl.ds(pos_ref[i], 1), :]

    # Fused B-fold replication: one vectorized full-block store per batch row.
    out_ref[...] = gathered[...]


# ----------------------------------------------------------------------------------
# Path B: table too large for VMEM.  Row gather straight from HBM with a bounded
# in-flight window of DMAs sharing ONE semaphore (one wait per copy), then the same
# per-batch-row replication.  pos is sorted; the VMEM path above already covers the
# small-table case where span-coalescing would matter most.
# TODO(synk): dynamic span-coalescing of consecutive sorted ids into multi-row DMAs.
# TODO(synk): for sub-32-bit table dtypes verify packed-tile row-DMA granularity
#             (demo uses f32); prefer the VMEM path for narrow dtypes.
# ----------------------------------------------------------------------------------
def _hbm_gather_kernel(pos_ref, emb_hbm, out_ref, gathered, sem):
    S = gathered.shape[0]
    W = min(_DMA_WINDOW, S)

    def _row_copy(i):
        # (1, D) row copy HBM -> VMEM scratch, all copies share the same semaphore
        return pltpu.make_async_copy(
            emb_hbm.at[pl.ds(pos_ref[i], 1), :],
            gathered.at[pl.ds(i, 1), :],
            sem.at[0],
        )

    @pl.when(pl.program_id(0) == 0)
    def _gather_once():
        # prime the window
        for i in range(W):
            _row_copy(i).start()

        @pl.loop(0, S)
        def _(i):
            # wait for one completion (shape-matched wait on the shared semaphore);
            # bounds in-flight copies to <= W, and after S iterations all are done.
            _row_copy(0).wait()

            @pl.when(i + W < S)
            def _():
                _row_copy(i + W).start()

    out_ref[...] = gathered[...]


def _fused_gather_broadcast(pos, embedding, batch, *, force_hbm_gather=False):
    """pos: (S,) int32 sorted ids; embedding: (P, D).  Returns (batch, S, D)."""
    P, D = embedding.shape
    S = int(pos.shape[0])
    itemsize = jnp.dtype(embedding.dtype).itemsize
    table_bytes = P * D * itemsize
    out_block_bytes = S * D * itemsize

    vmem_cap = _vmem_capacity_bytes()
    table_budget = vmem_cap // 4          # generation-aware: v7x only has 64 MiB physical
    use_vmem_table = (table_bytes <= table_budget) and not force_hbm_gather

    if use_vmem_table:
        kernel = _vmem_gather_kernel
        in_specs = [pl.BlockSpec((P, D), lambda b, pos_ref: (0, 0))]
        scratch_shapes = [pltpu.VMEM((S, D), embedding.dtype)]
        bytes_accessed = table_bytes + batch * out_block_bytes
        vmem_need = table_bytes + 3 * out_block_bytes + 4 * S + (1 << 20)
    else:
        kernel = _hbm_gather_kernel
        in_specs = [pl.BlockSpec(memory_space=pl.ANY)]   # table stays in HBM, no auto-DMA
        scratch_shapes = [pltpu.VMEM((S, D), embedding.dtype),
                          pltpu.SemaphoreType.DMA((1,))]  # single shared DMA semaphore
        bytes_accessed = S * D * itemsize + batch * out_block_bytes
        vmem_need = 4 * out_block_bytes + 4 * S + (1 << 20)

    vmem_limit = int(min(vmem_cap * 3 // 4, max(vmem_need, 16 << 20)))

    return pl.pallas_call(
        kernel,
        out_shape=jax.ShapeDtypeStruct((batch, S, D), embedding.dtype),
        grid_spec=pltpu.PrefetchScalarGridSpec(
            num_scalar_prefetch=1,                       # pos -> SMEM
            grid=(batch,),                               # fused per-batch-row replication
            in_specs=in_specs,
            out_specs=pl.BlockSpec((None, S, D), lambda b, pos_ref: (b, 0, 0)),
            scratch_shapes=scratch_shapes,
        ),
        compiler_params=pltpu.CompilerParams(
            # scratch tile is carried across batch steps -> sequential grid
            dimension_semantics=("arbitrary",),
            vmem_limit_bytes=vmem_limit,
        ),
        cost_estimate=pl.CostEstimate(
            flops=0, transcendentals=0, bytes_accessed=int(bytes_accessed)),
    )(pos, embedding)


def monotonic_random_position_embedding(x, embedding, key, *, force_hbm_gather=False):
    """Mirrors MonotonicRandomPositionEmbedding.forward.  Returns (B, S, emb_dim)."""
    B, S = x.shape[0], x.shape[1]
    num_positions, emb_dim = embedding.shape
    assert S <= num_positions, (
        f"sequence length {S} exceeds num_positions {num_positions}")
    # monotonic (sorted) random subset of position ids, shared across the batch
    perm = jax.random.permutation(key, num_positions)[:S]
    pos = jnp.sort(perm).astype(jnp.int32)
    return _fused_gather_broadcast(pos, embedding, B,
                                   force_hbm_gather=force_hbm_gather)


if __name__ == "__main__":
    num_positions = 64
    emb_dim = 32
    batch, seq = 2, 8

    root = jax.random.PRNGKey(0)
    k_emb, k_x, k_perm = jax.random.split(root, 3)

    # nn.Embedding default init is N(0, 1); initialize deterministically here.
    embedding = jax.random.normal(k_emb, (num_positions, emb_dim), dtype=jnp.float32)
    # x only contributes its leading (batch, seq) shape in the reference forward.
    x = jax.random.normal(k_x, (batch, seq, emb_dim), dtype=jnp.float32)

    # Pure-JAX reference for the same (deterministic) permutation.
    ref_ids = jnp.sort(jax.random.permutation(k_perm, num_positions)[:seq]).astype(jnp.int32)
    ref = jnp.broadcast_to(embedding[ref_ids][None], (batch, seq, emb_dim))

    # Fast path: table staged in VMEM, on-chip gather, fused broadcast.
    out = monotonic_random_position_embedding(x, embedding, k_perm)
    out = jax.block_until_ready(out)
    assert out.shape == (batch, seq, emb_dim)
    assert out.dtype == jnp.float32
    assert jnp.array_equal(out, ref), "VMEM-table path mismatch vs reference gather"

    # Fallback path (table left in HBM, windowed row-DMA gather) exercised explicitly.
    out_hbm = monotonic_random_position_embedding(x, embedding, k_perm,
                                                  force_hbm_gather=True)
    out_hbm = jax.block_until_ready(out_hbm)
    assert jnp.array_equal(out_hbm, ref), "HBM-gather path mismatch vs reference gather"

    print("KERNEL_OK")
</pallas_src>

<mosaic_0001>
module attributes {stable_mosaic.version = 11 : i64} {
  func.func @_vmem_gather_kernel(%arg0: i32, %arg1: memref<8xi32, #tpu.memory_space<smem>>, %arg2: memref<64x32xf32, #tpu.memory_space<vmem>>, %arg3: memref<1x8x32xf32, #tpu.memory_space<vmem>>, %arg4: memref<8x32xf32, #tpu.memory_space<vmem>>) attributes {dimension_semantics = [#tpu.dimension_semantics<arbitrary>], iteration_bounds = array<i64: 2>, scalar_prefetch = 1 : i64, scratch_operands = 1 : i64, tpu.core_type = #tpu.core_type<tc>, window_params = [{pipeline_mode = #tpu.pipeline_mode<synchronous>, transform_indices = @transform_0, window_bounds = array<i64: 64, 32>}, {transform_indices = @transform_1, window_bounds = array<i64: 1, 8, 32>}]} {
    %c0_i32 = arith.constant 0 : i32
    %0 = arith.cmpi eq, %arg0, %c0_i32 : i32
    %1 = arith.extui %0 : i1 to i32
    %c0_i32_0 = arith.constant 0 : i32
    %2 = arith.cmpi ne, %1, %c0_i32_0 : i32
    scf.if %2 {
      %c0_5 = arith.constant 0 : index
      %7 = memref.load %arg1[%c0_5] : memref<8xi32, #tpu.memory_space<smem>>
      %8 = arith.index_cast %7 : i32 to index
      %c0_6 = arith.constant 0 : index
      %9 = vector.load %arg2[%8, %c0_6] : memref<64x32xf32, #tpu.memory_space<vmem>>, vector<1x32xf32>
      %c0_7 = arith.constant 0 : index
      %c0_8 = arith.constant 0 : index
      %10 = vector.load %arg4[%c0_7, %c0_8] : memref<8x32xf32, #tpu.memory_space<vmem>>, vector<1x32xf32>
      tpu.vector_store %arg4[%c0_7, %c0_8], %9 {strides = array<i32>} : memref<8x32xf32, #tpu.memory_space<vmem>>, vector<1x32xf32>,
      %c1 = arith.constant 1 : index
      %11 = memref.load %arg1[%c1] : memref<8xi32, #tpu.memory_space<smem>>
      %12 = arith.index_cast %11 : i32 to index
      %c0_9 = arith.constant 0 : index
      %13 = vector.load %arg2[%12, %c0_9] : memref<64x32xf32, #tpu.memory_space<vmem>>, vector<1x32xf32>
      %c1_10 = arith.constant 1 : index
      %c0_11 = arith.constant 0 : index
      %14 = vector.load %arg4[%c1_10, %c0_11] : memref<8x32xf32, #tpu.memory_space<vmem>>, vector<1x32xf32>
      tpu.vector_store %arg4[%c1_10, %c0_11], %13 {strides = array<i32>} : memref<8x32xf32, #tpu.memory_space<vmem>>, vector<1x32xf32>,
      %c2 = arith.constant 2 : index
      %15 = memref.load %arg1[%c2] : memref<8xi32, #tpu.memory_space<smem>>
      %16 = arith.index_cast %15 : i32 to index
      %c0_12 = arith.constant 0 : index
      %17 = vector.load %arg2[%16, %c0_12] : memref<64x32xf32, #tpu.memory_space<vmem>>, vector<1x32xf32>
      %c2_13 = arith.constant 2 : index
      %c0_14 = arith.constant 0 : index
      %18 = vector.load %arg4[%c2_13, %c0_14] : memref<8x32xf32, #tpu.memory_space<vmem>>, vector<1x32xf32>
      tpu.vector_store %arg4[%c2_13, %c0_14], %17 {strides = array<i32>} : memref<8x32xf32, #tpu.memory_space<vmem>>, vector<1x32xf32>,
      %c3 = arith.constant 3 : index
      %19 = memref.load %arg1[%c3] : memref<8xi32, #tpu.memory_space<smem>>
      %20 = arith.index_cast %19 : i32 to index
      %c0_15 = arith.constant 0 : index
      %21 = vector.load %arg2[%20, %c0_15] : memref<64x32xf32, #tpu.memory_space<vmem>>, vector<1x32xf32>
      %c3_16 = arith.constant 3 : index
      %c0_17 = arith.constant 0 : index
      %22 = vector.load %arg4[%c3_16, %c0_17] : memref<8x32xf32, #tpu.memory_space<vmem>>, vector<1x32xf32>
      tpu.vector_store %arg4[%c3_16, %c0_17], %21 {strides = array<i32>} : memref<8x32xf32, #tpu.memory_space<vmem>>, vector<1x32xf32>,
      %c4 = arith.constant 4 : index
      %23 = memref.load %arg1[%c4] : memref<8xi32, #tpu.memory_space<smem>>
      %24 = arith.index_cast %23 : i32 to index
      %c0_18 = arith.constant 0 : index
      %25 = vector.load %arg2[%24, %c0_18] : memref<64x32xf32, #tpu.memory_space<vmem>>, vector<1x32xf32>
      %c4_19 = arith.constant 4 : index
      %c0_20 = arith.constant 0 : index
      %26 = vector.load %arg4[%c4_19, %c0_20] : memref<8x32xf32, #tpu.memory_space<vmem>>, vector<1x32xf32>
      tpu.vector_store %arg4[%c4_19, %c0_20], %25 {strides = array<i32>} : memref<8x32xf32, #tpu.memory_space<vmem>>, vector<1x32xf32>,
      %c5 = arith.constant 5 : index
      %27 = memref.load %arg1[%c5] : memref<8xi32, #tpu.memory_space<smem>>
      %28 = arith.index_cast %27 : i32 to index
      %c0_21 = arith.constant 0 : index
      %29 = vector.load %arg2[%28, %c0_21] : memref<64x32xf32, #tpu.memory_space<vmem>>, vector<1x32xf32>
      %c5_22 = arith.constant 5 : index
      %c0_23 = arith.constant 0 : index
      %30 = vector.load %arg4[%c5_22, %c0_23] : memref<8x32xf32, #tpu.memory_space<vmem>>, vector<1x32xf32>
      tpu.vector_store %arg4[%c5_22, %c0_23], %29 {strides = array<i32>} : memref<8x32xf32, #tpu.memory_space<vmem>>, vector<1x32xf32>,
      %c6 = arith.constant 6 : index
      %31 = memref.load %arg1[%c6] : memref<8xi32, #tpu.memory_space<smem>>
      %32 = arith.index_cast %31 : i32 to index
      %c0_24 = arith.constant 0 : index
      %33 = vector.load %arg2[%32, %c0_24] : memref<64x32xf32, #tpu.memory_space<vmem>>, vector<1x32xf32>
      %c6_25 = arith.constant 6 : index
      %c0_26 = arith.constant 0 : index
      %34 = vector.load %arg4[%c6_25, %c0_26] : memref<8x32xf32, #tpu.memory_space<vmem>>, vector<1x32xf32>
      tpu.vector_store %arg4[%c6_25, %c0_26], %33 {strides = array<i32>} : memref<8x32xf32, #tpu.memory_space<vmem>>, vector<1x32xf32>,
      %c7 = arith.constant 7 : index
      %35 = memref.load %arg1[%c7] : memref<8xi32, #tpu.memory_space<smem>>
      %36 = arith.index_cast %35 : i32 to index
      %c0_27 = arith.constant 0 : index
      %37 = vector.load %arg2[%36, %c0_27] : memref<64x32xf32, #tpu.memory_space<vmem>>, vector<1x32xf32>
      %c7_28 = arith.constant 7 : index
      %c0_29 = arith.constant 0 : index
      %38 = vector.load %arg4[%c7_28, %c0_29] : memref<8x32xf32, #tpu.memory_space<vmem>>, vector<1x32xf32>
      tpu.vector_store %arg4[%c7_28, %c0_29], %37 {strides = array<i32>} : memref<8x32xf32, #tpu.memory_space<vmem>>, vector<1x32xf32>,
    } else {
    }
    %c0 = arith.constant 0 : index
    %c0_1 = arith.constant 0 : index
    %3 = vector.load %arg4[%c0, %c0_1] : memref<8x32xf32, #tpu.memory_space<vmem>>, vector<8x32xf32>
    %c0_2 = arith.constant 0 : index
    %c0_3 = arith.constant 0 : index
    %c0_4 = arith.constant 0 : index
    %4 = vector.load %arg3[%c0_2, %c0_3, %c0_4] : memref<1x8x32xf32, #tpu.memory_space<vmem>>, vector<1x8x32xf32>
    %5 = vector.shape_cast %4 : vector<1x8x32xf32> to vector<8x32xf32>
    %6 = vector.shape_cast %3 : vector<8x32xf32> to vector<1x8x32xf32>
    tpu.vector_store %arg3[%c0_2, %c0_3, %c0_4], %6 {strides = array<i32>} : memref<1x8x32xf32, #tpu.memory_space<vmem>>, vector<1x8x32xf32>,
    return
  }
  func.func @transform_0(%arg0: i32, %arg1: memref<8xi32, #tpu.memory_space<smem>>) -> (i32, i32) {
    %c0_i32 = arith.constant 0 : i32
    %c0_i32_0 = arith.constant 0 : i32
    %c0_i32_1 = arith.constant 0 : i32
    return %c0_i32, %c0_i32_0 : i32, i32
  }
  func.func @transform_1(%arg0: i32, %arg1: memref<8xi32, #tpu.memory_space<smem>>) -> (i32, i32, i32) {
    %c0_i32 = arith.constant 0 : i32
    %c0_i32_0 = arith.constant 0 : i32
    %c0_i32_1 = arith.constant 0 : i32
    return %arg0, %c0_i32, %c0_i32_0 : i32, i32, i32
  }
}

</mosaic_0001>

<bundles_post_ra>
// kernel: tpu_custom_call.1
= control target key start
LH: loop header
LB: loop body
LE: loop exit
PB: predicated region body
PF: predicated region fallthrough
CT: control target
= control target key end

     0   :  { %s349_s12 = smov [#allocation4]   ;;  %s492_s0 = inlined_call_operand.vmem [shape: s32[8], index: 0, kind: input, shape index: {}]   ;;  %s493_s1 = inlined_call_operand.vmem [shape: f32[64,32], index: 1, kind: input, shape index: {}]   ;;  %s494_s2 = inlined_call_operand.hbm [shape: f32[2,8,32], index: 2, kind: output, shape index: {}]  }
   0x1   :  { %s8_s11 = sshll.u32 %s492_s0, 4  ;;  %s9_s11 = int_to_ptr.vmem [resolvable:$true] %s8_s11 }
   0x2   :  { %11 = dma.vmem_to_smem %s9_s11, 16, %s349_s12, [#allocation3] }
   0x3   :  { %327 = dma.done.wait [#allocation3], 16 }
   0x4   :  { %328 = vsyncadd [#allocation3], 4294967280 }
   0x5   :  { %14 = sfence }
   0x6   :  { %15 = vsyncpa [#allocation6], 0 }
   0x7   :  { %17 = vsyncpa [#allocation6 + $0x1], 0  ;;  %s368_s13 = smov 0   ;;  %s370_s14 = smov 0  }
   0x8   :  { %s372_s15 = smov 0   ;;  %s374_s16 = smov 0  }
   0x9 LB: > { %s389_s0 = sadd.s32 4294967295, %s347_s16   ;;  %s215_s17 = sadd.s32 4294967294, %s347_s16   ;;  %s347_s16 = sphi %s374_s16, %s502_s16   ;;  %s343_s15 = sphi %s372_s15, %s501_s15   ;;  %s339_s14 = sphi %s370_s14, %s500_s14   ;;  %s335_s13 = sphi %s368_s13, %s499_s13  }
   0xa   : > { %s393_s18 = sadd.s32 1, %s347_s16   ;;  %s51_s19 = sadd.s32 1, %s343_s15 }
   0xb   : > { %s48_s20 = ssub.s32 %s347_s16, %s393_s18  ;;  %p61_p0 = scmp.ne.s32.totalorder %s343_s15, %s339_s14 }
   0xc   : > { %p49_p1 = scmp.eq.s32.totalorder %s48_s20, 0  ;;  %p62_p2 = scmp.eq.s32.totalorder %s389_s0, 1 }
   0xd   : > { %p67_p3 = scmp.ne.s32.totalorder %s339_s14, %s335_s13  ;;  %p68_p4 = scmp.eq.s32.totalorder %s215_s17, 1 }
   0xe   : > { %s404_s21 = scalar_select %p49_p1, %s343_s15, %s51_s19  }
   0xf   : > { %p406_p5 = por %p62_p2, %p61_p0  ;;  %p410_p6 = por %p68_p4, %p67_p3 }
  0x10   : > { %p217_p7 = scmp.ge.s32.totalorder %s347_s16, 1  ;;  %p89_p8 = scmp.lt.s32.totalorder %s347_s16, 3 }
  0x12   : > { %p90_p9 = pnand %p217_p7, %p89_p8 }
  0x13   : > { %s495_s24 = sand.u32 (!%p90_p9), 1, %s339_s14   ;;  %p219_p10 = scmp.ne.s32.totalorder (!%p90_p9), %s389_s0, 0 }
  0x14   : > { %93 = sbr.rel (%p90_p9) target bundleno = 56 (0x38), region = 24  ;;  %s419_s25 = sshll.u32 (!%p90_p9), %s495_s24, 3 }
  0x15   : > { %s103_s26 = scalar_lea.vmem (!%p90_p9), [#allocation5], %s419_s25 }
  0x19   : > { %107 = sbr.rel (%p219_p10) target bundleno = 41 (0x29), region = 28  ;;  %s108_s27 = sld [smem:[#allocation4]] (!%p219_p10) }
  0x1a   : > { %s220_s28 = sld [smem:[#allocation4 + $0x1]] (!%p219_p10) }
  0x1b   : > { %s221_s29 = sld [smem:[#allocation4 + $0x2]] (!%p219_p10) }
  0x1c   : > { %s222_s30 = sld [smem:[#allocation4 + $0x3]] (!%p219_p10) }
  0x1d   : > { %s223_s3 = sld [smem:[#allocation4 + $0x4]] (!%p219_p10) }
  0x1e   : > { %vm111_vm0 = vcmask 253952   ;;  %s224_s4 = sld [smem:[#allocation4 + $0x5]] }
  0x1f   : > { %s109_s7 = scalar_lea.vmem %s493_s1, %s108_s27  ;;  %s225_s8 = sld [smem:[#allocation4 + $0x6]] }
  0x20   : > { %v110_v0 = vld [vmem:[%s109_s7] sm:$0x1]  ;;  %s114_s11 = scalar_lea.vmem %s493_s1, %s220_s28  ;;  %s226_s12 = sld [smem:[#allocation4 + $0x7]] }
  0x21   : > { %112 = vst.msk [vmem:[#allocation2] sm:$0x1] %vm111_vm0, %v110_v0  ;;  %v115_v1 = vld [vmem:[%s114_s11] sm:$0x1]  ;;  %s118_s20 = scalar_lea.vmem %s493_s1, %s221_s29 }
  0x22   : > { %116 = vst.msk [vmem:[#allocation2 + $0x1] sm:$0x1] %vm111_vm0, %v115_v1  ;;  %v119_v2 = vld [vmem:[%s118_s20] sm:$0x1]  ;;  %s122_s27 = scalar_lea.vmem %s493_s1, %s222_s30 }
  0x23   : > { %120 = vst.msk [vmem:[#allocation2 + $0x2] sm:$0x1] %vm111_vm0, %v119_v2  ;;  %v123_v3 = vld [vmem:[%s122_s27] sm:$0x1]  ;;  %s126_s7 = scalar_lea.vmem %s493_s1, %s223_s3 }
  0x24   : > { %124 = vst.msk [vmem:[#allocation2 + $0x3] sm:$0x1] %vm111_vm0, %v123_v3  ;;  %v127_v4 = vld [vmem:[%s126_s7] sm:$0x1]  ;;  %s130_s29 = scalar_lea.vmem %s493_s1, %s224_s4 }
  0x25   : > { %128 = vst.msk [vmem:[#allocation2 + $0x4] sm:$0x1] %vm111_vm0, %v127_v4  ;;  %v131_v5 = vld [vmem:[%s130_s29] sm:$0x1]  ;;  %s134_s30 = scalar_lea.vmem %s493_s1, %s225_s8 }
  0x26   : > { %132 = vst.msk [vmem:[#allocation2 + $0x5] sm:$0x1] %vm111_vm0, %v131_v5  ;;  %v135_v6 = vld [vmem:[%s134_s30] sm:$0x1]  ;;  %s138_s3 = scalar_lea.vmem %s493_s1, %s226_s12 }
  0x27   : > { %136 = vst.msk [vmem:[#allocation2 + $0x6] sm:$0x1] %vm111_vm0, %v135_v6  ;;  %v139_v7 = vld [vmem:[%s138_s3] sm:$0x1] }
  0x28   : > { %140 = vst.msk [vmem:[#allocation2 + $0x7] sm:$0x1] %vm111_vm0, %v139_v7 }
  0x29 PF: > { %vm142_vm1 = vcmask 261120   ;;  %s228_s4 = sshll.u32 %s389_s0, 3  ;;  %s157_s5 = sshll.u32 %s103_s26, 4  ;;  %s158_s5 = int_to_ptr.vmem [resolvable:$true] %s157_s5 }
  0x2a   : > { %s155_s12 = scalar_lea.hbm %s494_s2, %s228_s4  ;;  %s498_s6 = sand.u32 1, %s339_s14  }
  0x2b   : > { %s159_s27 = sshll.u32 %s155_s12, 4  ;;  %s145_s28 = scalar_lea.sflag [#allocation6], %s498_s6  ;;  %s160_s27 = int_to_ptr.hbm [resolvable:$true] %s159_s27 }
  0x2c   : > { %s297_s7 = sshra.s32 %s160_s27, 4  ;;  %s303_s29 = scalar_lea.hbm %s494_s2, 16  ;;  %s298_s7 = int_to_ptr.hbm [resolvable:$true] %s297_s7 }
  0x2d   : > { %s299_s9 = scalar_lea.hbm %s298_s7, 8  ;;  %p304_p0 = scmp.lt.s32.totalorder %s298_s7, %s494_s2 }
  0x2e   : > { %p300_p11 = scmp.ne.s32.totalorder %s298_s7, %s299_s9  ;;  %p305_p1 = scmp.lt.s32.totalorder %s303_s29, %s299_s9 }
  0x2f   : > { %v141_v8 = vld [vmem:[#allocation2] sm:$0xff] }
  0x30   : > { %143 = vst.msk [vmem:[%s103_s26] sm:$0xff] %vm142_vm1, %v141_v8  ;;  %p301_p12 = pnand %p300_p11, %p406_p5  ;;  %p306_p2 = por %p305_p1, %p304_p0 }
  0x32   : > { %p302_p13 = pneg %p301_p12 }
  0x34   : > { %p307_p3 = pnand %p306_p2, %p302_p13 }
  0x36   : > { %310 = shalt.err (!%p307_p3)
}
  0x37   : > { %231 = dma.vmem_to_hbm [thread:$0]  (%p406_p5), %s158_s5, 128, %s160_s27, %s145_s28  }
  0x38 PF: > { %p237_p4 = scmp.ge.s32.totalorder %s347_s16, 2  ;;  %s171_s25 = sand.u32 1, %s335_s13  }
  0x39   : > { %s172_s26 = scalar_lea.sflag [#allocation6], %s171_s25 }
  0x3a   : > { %p234_p7 = pnand %p237_p4, %p410_p6 }
  0x3c   : > { %p235_p8 = pneg %p234_p7 }
  0x3e   : > { %330 = dma.done.wait (%p235_p8), %s172_s26, 128  }
  0x3f   : > { %332 = vsyncadd (%p235_p8), %s172_s26, 4294967168  ;;  %p20_p9 = scmp.ge.s32.totalorder %s393_s18, 4   ;;  %s499_s13 = smov %s339_s14 }
  0x40   : > { %s500_s14 = smov %s343_s15  ;;  %s501_s15 = smov %s404_s21 }
  0x41   : > { %s502_s16 = smov %s393_s18  ;;  %22 = sbr.rel (!%p20_p9) target bundleno = 9 (0x9), region = 68 }
  0x46   :  { %178 = vsyncpa [#allocation6], 1 }
  0x47   :  { %180 = vsyncpa [#allocation6 + $0x1], 1 }

</bundles_post_ra>
